<compile_context>
chip_gen: v7x
topology: tpu7x:2x2x1
jax: 0.10.0
libtpu: 0.0.40
codegen_flags: <defaults>
</compile_context>

<pallas_src>
import jax
import jax.numpy as jnp
from jax import lax
from jax.experimental import pallas as pl
from jax.experimental.pallas import tpu as pltpu

EPS = 1e-4          # BatchNorm1d eps from the module (eps=0.0001)
NEG_SLOPE = 0.01    # F.leaky_relu default negative_slope


def _linear_bn_lrelu_kernel(x_ref, w_ref, o_ref):
    # Linear (no bias): contract x:(N, K) with w:(TN, K) over K on the MXU,
    # f32 accumulation.  No pre-transposed copy of W needed.
    y = lax.dot_general(
        x_ref[...], w_ref[...],
        dimension_numbers=(((1,), (1,)), ((), ())),
        preferred_element_type=jnp.float32,
    )  # (N, TN) f32

    # BatchNorm1d (training mode, affine=False): per-feature batch stats with
    # *biased* variance.  Center once and reuse for both var and normalization.
    inv_n = 1.0 / y.shape[0]
    mean = jnp.sum(y, axis=0, keepdims=True) * inv_n              # (1, TN)
    centered = y - mean
    var = jnp.sum(centered * centered, axis=0, keepdims=True) * inv_n
    y_hat = centered * lax.rsqrt(var + EPS)                       # rsqrt -> EUP

    # Leaky ReLU (negative_slope = 0.01).
    o_ref[...] = jnp.where(y_hat >= 0, y_hat, NEG_SLOPE * y_hat).astype(o_ref.dtype)


def linear_bn_leaky_relu(x, w, *, feature_tile=128, use_bf16_matmul=False):
    """Fused Linear(bias=False) + BatchNorm1d(affine=False, training) + LeakyReLU.

    x: (N, in_features) f32
    w: (out_features, in_features) f32   (PyTorch nn.Linear weight layout)
    returns: (N, out_features) f32
    """
    n, in_f = x.shape
    out_f, in_f_w = w.shape
    assert in_f == in_f_w, "weight / input feature mismatch"

    # Lane-dense output: pad out_features up to a multiple of the feature tile.
    # Zero weight rows -> zero activations; BN on the pad is well-defined
    # (0 / sqrt(0 + eps) = 0) and the pad is sliced off below.
    tn = feature_tile
    out_f_pad = ((out_f + tn - 1) // tn) * tn
    if out_f_pad != out_f:
        w = jnp.pad(w, ((0, out_f_pad - out_f), (0, 0)))

    # Optional bf16 MXU operands (f32 accumulate + f32 BN epilogue) for v6e/v7x.
    if use_bf16_matmul:
        x_in = x.astype(jnp.bfloat16)
        w_in = w.astype(jnp.bfloat16)
    else:
        x_in, w_in = x, w

    grid = (out_f_pad // tn,)

    # VMEM budget: double-buffered input blocks + output block, with headroom,
    # capped well under v7x's 64 MiB physical VMEM.
    in_item = jnp.dtype(x_in.dtype).itemsize
    block_bytes = 2 * (n * in_f * in_item + tn * in_f * in_item + n * tn * 4)
    vmem_limit = min(max(4 * block_bytes, 16 << 20), 48 << 20)

    out = pl.pallas_call(
        _linear_bn_lrelu_kernel,
        out_shape=jax.ShapeDtypeStruct((n, out_f_pad), jnp.float32),
        grid_spec=pltpu.PrefetchScalarGridSpec(
            num_scalar_prefetch=0,
            grid=grid,
            in_specs=[
                pl.BlockSpec((n, in_f), lambda j: (0, 0)),    # full batch resident
                pl.BlockSpec((tn, in_f), lambda j: (j, 0)),   # feature tile of W
            ],
            out_specs=pl.BlockSpec((n, tn), lambda j: (0, j)),  # lane-dense (.,128)
        ),
        compiler_params=pltpu.CompilerParams(
            dimension_semantics=("parallel",),   # feature tiles are independent
            vmem_limit_bytes=vmem_limit,
        ),
    )(x_in, w_in)

    return out[:, :out_f] if out_f_pad != out_f else out


def _reference(x, w):
    """Pure-JAX reference matching the PyTorch module in training mode."""
    y = x @ w.T
    mean = jnp.mean(y, axis=0, keepdims=True)
    var = jnp.mean((y - mean) ** 2, axis=0, keepdims=True)   # biased variance
    y_hat = (y - mean) / jnp.sqrt(var + EPS)
    return jnp.where(y_hat >= 0, y_hat, NEG_SLOPE * y_hat)


if __name__ == "__main__":
    key = jax.random.PRNGKey(0)
    kx, kw = jax.random.split(key)

    batch = 8
    in_features = 32
    out_features = 64

    # Deterministic synthetic input and weight (PyTorch-style uniform init range).
    x = jax.random.normal(kx, (batch, in_features), dtype=jnp.float32)
    bound = 1.0 / (in_features ** 0.5)
    w = jax.random.uniform(
        kw, (out_features, in_features), minval=-bound, maxval=bound,
        dtype=jnp.float32,
    )

    ref = _reference(x, w)

    # f32 path: exact-semantics check.
    out = jax.block_until_ready(linear_bn_leaky_relu(x, w))
    assert out.shape == (batch, out_features)
    assert jnp.allclose(out, ref, atol=1e-4, rtol=1e-4), "f32 kernel mismatch vs reference"

    # bf16-operand matmul path (v6e/v7x MXU): looser tolerance for operand rounding.
    out_bf16 = jax.block_until_ready(linear_bn_leaky_relu(x, w, use_bf16_matmul=True))
    assert out_bf16.shape == (batch, out_features)
    assert jnp.allclose(out_bf16, ref, atol=5e-2, rtol=5e-2), "bf16 kernel mismatch vs reference"

    print("KERNEL_OK")
</pallas_src>

<mosaic_0001>
module attributes {stable_mosaic.version = 11 : i64} {
  func.func @_linear_bn_lrelu_kernel(%arg0: i32, %arg1: memref<8x32xf32, #tpu.memory_space<vmem>>, %arg2: memref<128x32xf32, #tpu.memory_space<vmem>>, %arg3: memref<8x128xf32, #tpu.memory_space<vmem>>) attributes {dimension_semantics = [#tpu.dimension_semantics<parallel>], iteration_bounds = array<i64: 1>, scalar_prefetch = 0 : i64, scratch_operands = 0 : i64, tpu.core_type = #tpu.core_type<tc>, window_params = [{pipeline_mode = #tpu.pipeline_mode<synchronous>, transform_indices = @transform_0, window_bounds = array<i64: 8, 32>}, {transform_indices = @transform_1, window_bounds = array<i64: 128, 32>}, {transform_indices = @transform_2, window_bounds = array<i64: 8, 128>}]} {
    %c0 = arith.constant 0 : index
    %c0_0 = arith.constant 0 : index
    %0 = vector.load %arg1[%c0, %c0_0] : memref<8x32xf32, #tpu.memory_space<vmem>>, vector<8x32xf32>
    %c0_1 = arith.constant 0 : index
    %c0_2 = arith.constant 0 : index
    %1 = vector.load %arg2[%c0_1, %c0_2] : memref<128x32xf32, #tpu.memory_space<vmem>>, vector<128x32xf32>
    %cst = arith.constant dense<0.000000e+00> : vector<8x128xf32>
    %2 = tpu.matmul %0, %1, %cst {dimension_numbers = #tpu.dot_dimension_numbers<[1], [1], [0], [0], [0, 0, 1, 0], [], []>} : vector<8x32xf32>, vector<128x32xf32>, vector<8x128xf32> -> vector<8x128xf32>
    %cst_3 = arith.constant dense<0.000000e+00> : vector<128xf32>
    %3 = vector.multi_reduction <add>, %2, %cst_3 [0] : vector<8x128xf32> to vector<128xf32>
    %4 = vector.shape_cast %3 : vector<128xf32> to vector<1x128xf32>
    %cst_4 = arith.constant 1.250000e-01 : f32
    %5 = vector.broadcast %cst_4 : f32 to vector<1x128xf32>
    %6 = arith.mulf %4, %5 : vector<1x128xf32>
    %7 = vector.broadcast %6 : vector<1x128xf32> to vector<8x128xf32>
    %8 = arith.subf %2, %7 : vector<8x128xf32>
    %9 = arith.mulf %8, %8 : vector<8x128xf32>
    %cst_5 = arith.constant dense<0.000000e+00> : vector<128xf32>
    %10 = vector.multi_reduction <add>, %9, %cst_5 [0] : vector<8x128xf32> to vector<128xf32>
    %11 = vector.shape_cast %10 : vector<128xf32> to vector<1x128xf32>
    %cst_6 = arith.constant 1.250000e-01 : f32
    %12 = vector.broadcast %cst_6 : f32 to vector<1x128xf32>
    %13 = arith.mulf %11, %12 : vector<1x128xf32>
    %cst_7 = arith.constant 9.99999974E-5 : f32
    %14 = vector.broadcast %cst_7 : f32 to vector<1x128xf32>
    %15 = arith.addf %13, %14 : vector<1x128xf32>
    %16 = math.rsqrt %15 : vector<1x128xf32>
    %17 = vector.broadcast %16 : vector<1x128xf32> to vector<8x128xf32>
    %18 = arith.mulf %8, %17 : vector<8x128xf32>
    %cst_8 = arith.constant 0.000000e+00 : f32
    %19 = vector.broadcast %cst_8 : f32 to vector<8x128xf32>
    %20 = arith.cmpf oge, %18, %19 : vector<8x128xf32>
    %cst_9 = arith.constant 0.00999999977 : f32
    %21 = vector.broadcast %cst_9 : f32 to vector<8x128xf32>
    %22 = arith.mulf %21, %18 : vector<8x128xf32>
    %23 = arith.select %20, %18, %22 : vector<8x128xi1>, vector<8x128xf32>
    %c0_10 = arith.constant 0 : index
    %c0_11 = arith.constant 0 : index
    %24 = vector.load %arg3[%c0_10, %c0_11] : memref<8x128xf32, #tpu.memory_space<vmem>>, vector<8x128xf32>
    tpu.vector_store %arg3[%c0_10, %c0_11], %23 {strides = array<i32>} : memref<8x128xf32, #tpu.memory_space<vmem>>, vector<8x128xf32>,
    return
  }
  func.func @transform_0(%arg0: i32) -> (i32, i32) {
    %c0_i32 = arith.constant 0 : i32
    %c0_i32_0 = arith.constant 0 : i32
    %c0_i32_1 = arith.constant 0 : i32
    return %c0_i32, %c0_i32_0 : i32, i32
  }
  func.func @transform_1(%arg0: i32) -> (i32, i32) {
    %c0_i32 = arith.constant 0 : i32
    %c0_i32_0 = arith.constant 0 : i32
    return %arg0, %c0_i32 : i32, i32
  }
  func.func @transform_2(%arg0: i32) -> (i32, i32) {
    %c0_i32 = arith.constant 0 : i32
    %c0_i32_0 = arith.constant 0 : i32
    return %c0_i32, %arg0 : i32, i32
  }
}

</mosaic_0001>

<bundles_post_ra>
// kernel: tpu_custom_call.1
= control target key start
LH: loop header
LB: loop body
LE: loop exit
PB: predicated region body
PF: predicated region fallthrough
CT: control target
= control target key end

     0   :  { %vm29_vm0 = vcmask 261120   ;;  %v319_v2 = vmov 0.0|0.0   ;;  %vm320_vm2 = vmmov 0   ;;  %v321_v5 = vmov 0.0   ;;  %s424_s0 = inlined_call_operand.vmem [shape: f32[8,32], index: 0, kind: input, shape index: {}]   ;;  %s425_s1 = inlined_call_operand.vmem [shape: f32[128,32], index: 1, kind: input, shape index: {}]   ;;  %s426_s2 = inlined_call_operand.hbm [shape: f32[8,128], index: 2, kind: output, shape index: {}]  }
   0x1   :  { %v13_v0 = vld [vmem:[%s425_s1] sm:$0xff]  ;;  %v14_v1 = vld [vmem:[%s425_s1 + $0x8] sm:$0xff]  ;;  %257 = vmatprep.subr.bf16.mxu0 %v319_v2  ;;  %vm346_vm1 = vmpackc.low %vm29_vm0, %vm29_vm0  ;;  %254 = vmatprep.mubr.msk.f32.mxu0 %vm320_vm2, %v321_v5 }
   0x2   :  { %v258_v3 = vpack.c.bf16 %v14_v1, %v13_v0  ;;  %v15_v6 = vld [vmem:[%s425_s1 + $0x10] sm:$0xff]  ;;  %v16_v7 = vld [vmem:[%s425_s1 + $0x18] sm:$0xff] }
   0x4   :  { %260 = vmatpush3.bf16.xpose.msk.msra.mxu0 %vm346_vm1, %v258_v3 }
   0x5   :  { %261 = vmatprep.subr.bf16.mxu0 %v319_v2 }
   0x6   :  { %7 = vsyncpa [#allocation3], 0  ;;  %v262_v8 = vpack.c.bf16 %v16_v7, %v15_v6  ;;  %v17_v9 = vld [vmem:[%s425_s1 + $0x20] sm:$0xff]  ;;  %v18_v10 = vld [vmem:[%s425_s1 + $0x28] sm:$0xff] }
   0x7   :  { %v266_v11 = vpack.c.bf16 %v18_v10, %v17_v9  ;;  %v19_v12 = vld [vmem:[%s425_s1 + $0x30] sm:$0xff]  ;;  %v20_v13 = vld [vmem:[%s425_s1 + $0x38] sm:$0xff]  ;;  %v21_v15 = vld [vmem:[%s425_s1 + $0x40] sm:$0xff] }
   0x8   :  { %v270_v14 = vpack.c.bf16 %v20_v13, %v19_v12  ;;  %v22_v16 = vld [vmem:[%s425_s1 + $0x48] sm:$0xff]  ;;  %v23_v18 = vld [vmem:[%s425_s1 + $0x50] sm:$0xff]  ;;  %v24_v19 = vld [vmem:[%s425_s1 + $0x58] sm:$0xff] }
   0x9   :  { %v274_v17 = vpack.c.bf16 %v22_v16, %v21_v15  ;;  %v278_v20 = vpack.c.bf16 %v24_v19, %v23_v18  ;;  %v25_v21 = vld [vmem:[%s425_s1 + $0x60] sm:$0xff]  ;;  %v26_v22 = vld [vmem:[%s425_s1 + $0x68] sm:$0xff]  ;;  %v27_v24 = vld [vmem:[%s425_s1 + $0x70] sm:$0xff] }
   0xa   :  { %v282_v23 = vpack.c.bf16 %v26_v22, %v25_v21  ;;  %v28_v25 = vld [vmem:[%s425_s1 + $0x78] sm:$0xff]  ;;  %v12_v27 = vld [vmem:[%s424_s0] sm:$0xff]  ;;  %s322_s0 = smov [#allocation2]  }
   0xb   :  { %v286_v26 = vpack.c.bf16 %v28_v25, %v27_v24  ;;  %s180_s1 = sshll.u32 %s322_s0, 4  ;;  %s181_s1 = int_to_ptr.vmem [resolvable:$true] %s180_s1 }
   0xc   :  { %264 = vmatpush3.bf16.xpose.msk.msra.mxu0 %vm346_vm1, %v262_v8  ;;  %s295_s15 = scalar_lea.vmem %s181_s1, 128  ;;  %p300_p1 = scmp.lt.s32.totalorder %s181_s1, %s181_s1 }
   0xd   :  { %265 = vmatprep.subr.bf16.mxu0 %v319_v2  ;;  %p296_p0 = scmp.ne.s32.totalorder %s181_s1, %s295_s15  ;;  %p301_p2 = scmp.lt.s32.totalorder %s295_s15, %s295_s15 }
   0xf   :  { %p302_p3 = por %p301_p2, %p300_p1 }
  0x11   :  { %p303_p4 = pnand %p302_p3, %p296_p0 }
  0x14   :  { %268 = vmatpush3.bf16.xpose.msk.msra.mxu0 %vm346_vm1, %v266_v11 }
  0x15   :  { %269 = vmatprep.subr.bf16.mxu0 %v319_v2 }
  0x1c   :  { %272 = vmatpush3.bf16.xpose.msk.msra.mxu0 %vm346_vm1, %v270_v14 }
  0x1d   :  { %273 = vmatprep.subr.bf16.mxu0 %v319_v2 }
  0x24   :  { %276 = vmatpush3.bf16.xpose.msk.msra.mxu0 %vm346_vm1, %v274_v17 }
  0x25   :  { %277 = vmatprep.subr.bf16.mxu0 %v319_v2 }
  0x2c   :  { %280 = vmatpush3.bf16.xpose.msk.msra.mxu0 %vm346_vm1, %v278_v20 }
  0x2d   :  { %281 = vmatprep.subr.bf16.mxu0 %v319_v2 }
  0x34   :  { %284 = vmatpush3.bf16.xpose.msk.msra.mxu0 %vm346_vm1, %v282_v23 }
  0x35   :  { %285 = vmatprep.subr.bf16.mxu0 %v319_v2 }
  0x3c   :  { %288 = vmatpush3.bf16.xpose.msk.msra.mxu0 %vm346_vm1, %v286_v26 }
  0x43   :  { %255 = vmatmul.mubr.msk.f32.vlgmr.msra.gmra.mrb[0].mxu0 %vm29_vm0, %v12_v27 }
 0x116   :  { %v147_v28 = vpop.f32.mrb[0].mxu0 }
 0x117   :  { %v151_v29 = vrot.slane %v147_v28, 4  ;;  %v256_v30 = vpop.f32.mrb[1].mxu0 }
 0x119   :  { %v152_v31 = vadd.f32 %v151_v29, %v147_v28 }
 0x11b   :  { %v153_v32 = vrot.slane %v152_v31, 2 }
 0x11d   :  { %v154_v33 = vadd.f32 %v153_v32, %v152_v31 }
 0x11f   :  { %v155_v34 = vrot.slane %v154_v33, 1 }
 0x121   :  { %v156_v35 = vadd.f32 %v155_v34, %v154_v33 }
 0x123   :  { %v157_v36 = vmul.f32 0.125, %v156_v35 }
 0x125   :  { %v158_v37 = vsub.f32 %v147_v28, %v157_v36 }
 0x127   :  { %v159_v38 = vmul.f32 %v158_v37, %v158_v37 }
 0x129   :  { %v160_v39 = vrot.slane %v159_v38, 4 }
 0x12b   :  { %v161_v40 = vadd.f32 %v160_v39, %v159_v38 }
 0x12d   :  { %v162_v41 = vrot.slane %v161_v40, 2 }
 0x12f   :  { %v163_v42 = vadd.f32 %v162_v41, %v161_v40 }
 0x131   :  { %v164_v43 = vrot.slane %v163_v42, 1 }
 0x133   :  { %v165_v44 = vadd.f32 %v164_v43, %v163_v42 }
 0x135   :  { %v166_v45 = vmul.f32 0.125, %v165_v44 }
 0x137   :  { %v167_v46 = vadd.f32 0.0001, %v166_v45 }
 0x139   :  { %293 = vrsqrt.f32 %v167_v46 }
 0x143   :  { %v294_v47 = vpop.eup %293 }
 0x144   :  { %v169_v48 = vmul.f32 %v294_v47, %v158_v37 }
 0x146   :  { %vm170_vm3 = vcmp.ge.f32.partialorder %v169_v48, 0.0  ;;  %v171_v49 = vmul.f32 0.01, %v169_v48 }
 0x148   :  { %v172_v50 = vsel %vm170_vm3, %v169_v48, %v171_v49 }
 0x149   :  { %173 = vst [vmem:[#allocation2] sm:$0xff] %v172_v50 }
 0x14a   :  { %306 = shalt.err (!%p303_p4)
}
 0x14b   :  { %s307_s18 = scalar_lea.hbm %s426_s2, 128 }
 0x14c   :  { %p308_p5 = scmp.ne.s32.totalorder %s426_s2, %s307_s18  ;;  %p311_p6 = scmp.lt.u32.totalorder %s307_s18, %s426_s2 }
 0x14e   :  { %p313_p7 = pnand %p311_p6, %p308_p5 }
 0x150   :  { %316 = shalt.err (!%p313_p7)
}
 0x151   :  { %183 = dma.vmem_to_hbm [thread:$0]  %s181_s1, 128, %s426_s2, [#allocation3]  }
 0x152   :  { %317 = dma.done.wait [#allocation3], 128  }
 0x153   :  { %318 = vsyncadd [#allocation3], 4294967168 }
 0x154   :  { %187 = vsyncpa [#allocation3], 1 }

</bundles_post_ra>
